<compile_context>
chip_gen: v5e
topology: v5e:2x2
jax: 0.10.0
libtpu: 0.0.40
codegen_flags: <defaults>
</compile_context>

<pallas_src>
import jax
import jax.numpy as jnp
from jax.experimental import pallas as pl
from jax.experimental.pallas import tpu as pltpu

EPS = 1e-5


# ----------------------------------------------------------------------------
# Phase 1: per-batch partial per-hidden-channel sum / sum-of-squares of
#          u = W1 @ x.  Grid (N, HW tiles); HW axis is the reduction, the
#          (1, Hd, 1) output blocks stay resident across it.
# ----------------------------------------------------------------------------
def stats_kernel(x_ref, w1_ref, sum_ref, sumsq_ref):
    @pl.when(pl.program_id(1) == 0)
    def _init():
        sum_ref[...] = jnp.zeros_like(sum_ref)
        sumsq_ref[...] = jnp.zeros_like(sumsq_ref)

    x = x_ref[0]                                          # (Cin, hw_tile)
    u = jnp.dot(w1_ref[...], x,
                preferred_element_type=jnp.float32)       # (Hd, hw_tile)
    sum_ref[0] += jnp.sum(u, axis=1, keepdims=True)       # (Hd, 1)
    sumsq_ref[0] += jnp.sum(u * u, axis=1, keepdims=True)


# ----------------------------------------------------------------------------
# Phase 2: h = W1_scaled @ x + shift ; ReLU ; y = W2 @ h + b2
# Grid (N, HW tiles), both axes independent ('parallel').
# ----------------------------------------------------------------------------
def apply_kernel(x_ref, w1s_ref, shift_ref, w2_ref, b2_ref, o_ref):
    x = x_ref[0]                                          # (Cin, hw_tile)
    h = jnp.dot(w1s_ref[...], x,
                preferred_element_type=jnp.float32) + shift_ref[...]
    h = jnp.maximum(h, 0.0)                               # (Hd, hw_tile)
    y = jnp.dot(w2_ref[...], h,
                preferred_element_type=jnp.float32) + b2_ref[...]
    o_ref[0] = y.astype(o_ref.dtype)                      # (Cout, hw_tile)


def _pick_hw_tile(hw):
    """Largest lane-dense tile (multiple of 128) dividing HW, else full HW."""
    for t in (2048, 1024, 512, 256, 128):
        if hw % t == 0:
            return t
    return hw  # full-extent block (always legal)


@jax.jit
def rfpm_output_net(x_nchw, params):
    """x_nchw: (N, Cin, H, W) float32 -> (N, Cout, H, W) float32."""
    w1, b1, gamma, beta, w2, b2 = params        # b1 cancels under BN (unused)
    del b1
    N, Cin, H, W = x_nchw.shape
    Hd = w1.shape[0]
    Cout = w2.shape[0]
    HW = H * W
    P = N * HW

    # Free, contiguous reshape: channels on sublanes, pixels on lanes.
    x3d = x_nchw.reshape(N, Cin, HW)
    t = _pick_hw_tile(HW)
    n_t = HW // t

    # --------------------------- phase 1: stats -----------------------------
    stats_cost = pl.CostEstimate(
        flops=int(2 * P * Cin * Hd + 3 * P * Hd),
        transcendentals=0,
        bytes_accessed=int(4 * (N * Cin * HW + Hd * Cin + 2 * N * Hd)))
    s_part, sq_part = pl.pallas_call(
        stats_kernel,
        out_shape=(jax.ShapeDtypeStruct((N, Hd, 1), jnp.float32),
                   jax.ShapeDtypeStruct((N, Hd, 1), jnp.float32)),
        grid=(N, n_t),
        in_specs=[
            pl.BlockSpec((1, Cin, t), lambda n, i: (n, 0, i)),
            pl.BlockSpec((Hd, Cin), lambda n, i: (0, 0)),
        ],
        out_specs=(pl.BlockSpec((1, Hd, 1), lambda n, i: (n, 0, 0)),
                   pl.BlockSpec((1, Hd, 1), lambda n, i: (n, 0, 0))),
        compiler_params=pltpu.CompilerParams(
            dimension_semantics=("parallel", "arbitrary"),
            vmem_limit_bytes=32 << 20),
        cost_estimate=stats_cost,
    )(x3d, w1)

    # Combine per-batch partials; fold BN into a per-channel scale/shift (tiny
    # Hd-sized ops) and fold the scale directly into the conv1 weights for the
    # apply pass.  Biased batch variance (PyTorch training-mode normalization);
    # f32 accumulation guards the E[u^2] - E[u]^2 cancellation.
    s = jnp.sum(s_part, axis=0)                            # (Hd, 1)
    sq = jnp.sum(sq_part, axis=0)                          # (Hd, 1)
    mean = s / P                                           # (Hd, 1)
    var = jnp.maximum(sq / P - mean * mean, 0.0)           # (Hd, 1)
    scale = gamma.reshape(Hd, 1) * jax.lax.rsqrt(var + EPS)
    shift = beta.reshape(Hd, 1) - mean * scale
    w1s = w1 * scale                                       # (Hd, Cin)

    # --------------------------- phase 2: apply -----------------------------
    apply_cost = pl.CostEstimate(
        flops=int(2 * P * Cin * Hd + 2 * P * Hd * Cout + 3 * P * Hd),
        transcendentals=0,
        bytes_accessed=int(4 * (N * Cin * HW + N * Cout * HW +
                                Hd * Cin + Hd + Cout * Hd + Cout)))
    out3d = pl.pallas_call(
        apply_kernel,
        out_shape=jax.ShapeDtypeStruct((N, Cout, HW), jnp.float32),
        grid=(N, n_t),
        in_specs=[
            pl.BlockSpec((1, Cin, t), lambda n, i: (n, 0, i)),
            pl.BlockSpec((Hd, Cin), lambda n, i: (0, 0)),
            pl.BlockSpec((Hd, 1), lambda n, i: (0, 0)),
            pl.BlockSpec((Cout, Hd), lambda n, i: (0, 0)),
            pl.BlockSpec((Cout, 1), lambda n, i: (0, 0)),
        ],
        out_specs=pl.BlockSpec((1, Cout, t), lambda n, i: (n, 0, i)),
        compiler_params=pltpu.CompilerParams(
            dimension_semantics=("parallel", "parallel"),
            vmem_limit_bytes=32 << 20),
        cost_estimate=apply_cost,
    )(x3d, w1s, shift, w2, b2.reshape(Cout, 1))

    return out3d.reshape(N, Cout, H, W)


def init_params(key, input_dim, output_dim, hidden_dim):
    """Synthetic parameters in PyTorch layout (1x1 conv weights squeezed)."""
    k1, k2, k3, k4, k5, k6 = jax.random.split(key, 6)
    w1 = jax.random.normal(k1, (hidden_dim, input_dim), jnp.float32) * 0.1
    b1 = jax.random.normal(k2, (hidden_dim,), jnp.float32) * 0.01
    gamma = 1.0 + 0.1 * jax.random.normal(k3, (hidden_dim,), jnp.float32)
    beta = 0.1 * jax.random.normal(k4, (hidden_dim,), jnp.float32)
    w2 = jax.random.normal(k5, (output_dim, hidden_dim), jnp.float32) * 0.1
    b2 = jax.random.normal(k6, (output_dim,), jnp.float32) * 0.01
    return (w1, b1, gamma, beta, w2, b2)


def _reference(x, params):
    """Pure-JAX NCHW reference (includes b1; BN cancels it analytically)."""
    w1, b1, gamma, beta, w2, b2 = params
    hp = jax.lax.Precision.HIGHEST
    h = jnp.einsum('oc,nchw->nohw', w1, x, precision=hp) \
        + b1[None, :, None, None]
    mean = jnp.mean(h, axis=(0, 2, 3), keepdims=True)
    var = jnp.mean((h - mean) ** 2, axis=(0, 2, 3), keepdims=True)
    h = (h - mean) * jax.lax.rsqrt(var + EPS)
    h = h * gamma[None, :, None, None] + beta[None, :, None, None]
    h = jnp.maximum(h, 0.0)
    y = jnp.einsum('oc,nchw->nohw', w2, h, precision=hp) \
        + b2[None, :, None, None]
    return y


if __name__ == "__main__":
    key = jax.random.PRNGKey(0)
    kx, kp = jax.random.split(key)

    N, Cin, H, W = 2, 4, 16, 16
    hidden_dim, output_dim = 32, 8

    x = jax.random.normal(kx, (N, Cin, H, W), jnp.float32)
    params = init_params(kp, Cin, output_dim, hidden_dim)

    out = jax.block_until_ready(rfpm_output_net(x, params))
    ref = _reference(x, params)

    assert out.shape == (N, output_dim, H, W), out.shape
    max_err = float(jnp.max(jnp.abs(out - ref)))
    assert max_err < 2e-4, max_err

    print("KERNEL_OK")
</pallas_src>

<mosaic_0001>
module attributes {stable_mosaic.version = 11 : i64} {
  func.func @stats_kernel(%arg0: i32, %arg1: i32, %arg2: memref<1x4x256xf32, #tpu.memory_space<vmem>>, %arg3: memref<32x4xf32, #tpu.memory_space<vmem>>, %arg4: memref<1x32x1xf32, #tpu.memory_space<vmem>>, %arg5: memref<1x32x1xf32, #tpu.memory_space<vmem>>) attributes {dimension_semantics = [#tpu.dimension_semantics<parallel>, #tpu.dimension_semantics<arbitrary>], iteration_bounds = array<i64: 2, 1>, scalar_prefetch = 0 : i64, scratch_operands = 0 : i64, tpu.core_type = #tpu.core_type<tc>, window_params = [{transform_indices = @transform_0, window_bounds = array<i64: 1, 4, 256>}, {pipeline_mode = #tpu.pipeline_mode<synchronous>, transform_indices = @transform_1, window_bounds = array<i64: 32, 4>}, {transform_indices = @transform_2, window_bounds = array<i64: 1, 32, 1>}, {transform_indices = @transform_3, window_bounds = array<i64: 1, 32, 1>}]} {
    %c0_i32 = arith.constant 0 : i32
    %0 = arith.cmpi eq, %arg1, %c0_i32 : i32
    %1 = arith.extui %0 : i1 to i32
    %c0_i32_0 = arith.constant 0 : i32
    %2 = arith.cmpi ne, %1, %c0_i32_0 : i32
    scf.if %2 {
      %cst_19 = arith.constant 0.000000e+00 : f32
      %24 = vector.broadcast %cst_19 : f32 to vector<1x32x1xf32>
      %c0_20 = arith.constant 0 : index
      %c0_21 = arith.constant 0 : index
      %c0_22 = arith.constant 0 : index
      %25 = vector.load %arg4[%c0_20, %c0_21, %c0_22] : memref<1x32x1xf32, #tpu.memory_space<vmem>>, vector<1x32x1xf32>
      tpu.vector_store %arg4[%c0_20, %c0_21, %c0_22], %24 {strides = array<i32>} : memref<1x32x1xf32, #tpu.memory_space<vmem>>, vector<1x32x1xf32>,
      %cst_23 = arith.constant 0.000000e+00 : f32
      %26 = vector.broadcast %cst_23 : f32 to vector<1x32x1xf32>
      %c0_24 = arith.constant 0 : index
      %c0_25 = arith.constant 0 : index
      %c0_26 = arith.constant 0 : index
      %27 = vector.load %arg5[%c0_24, %c0_25, %c0_26] : memref<1x32x1xf32, #tpu.memory_space<vmem>>, vector<1x32x1xf32>
      tpu.vector_store %arg5[%c0_24, %c0_25, %c0_26], %26 {strides = array<i32>} : memref<1x32x1xf32, #tpu.memory_space<vmem>>, vector<1x32x1xf32>,
    } else {
    }
    %c0 = arith.constant 0 : index
    %c0_1 = arith.constant 0 : index
    %c0_2 = arith.constant 0 : index
    %3 = vector.load %arg2[%c0, %c0_1, %c0_2] : memref<1x4x256xf32, #tpu.memory_space<vmem>>, vector<1x4x256xf32>
    %4 = vector.shape_cast %3 : vector<1x4x256xf32> to vector<4x256xf32>
    %c0_3 = arith.constant 0 : index
    %c0_4 = arith.constant 0 : index
    %5 = vector.load %arg3[%c0_3, %c0_4] : memref<32x4xf32, #tpu.memory_space<vmem>>, vector<32x4xf32>
    %cst = arith.constant dense<0.000000e+00> : vector<32x256xf32>
    %6 = tpu.matmul %5, %4, %cst {dimension_numbers = #tpu.dot_dimension_numbers<[1], [0], [0], [1], [0, 0, 1, 1], [], []>} : vector<32x4xf32>, vector<4x256xf32>, vector<32x256xf32> -> vector<32x256xf32>
    %c0_5 = arith.constant 0 : index
    %c0_6 = arith.constant 0 : index
    %c0_7 = arith.constant 0 : index
    %7 = vector.load %arg4[%c0_5, %c0_6, %c0_7] : memref<1x32x1xf32, #tpu.memory_space<vmem>>, vector<1x32x1xf32>
    %8 = vector.shape_cast %7 : vector<1x32x1xf32> to vector<32x1xf32>
    %cst_8 = arith.constant dense<0.000000e+00> : vector<32xf32>
    %9 = vector.multi_reduction <add>, %6, %cst_8 [1] : vector<32x256xf32> to vector<32xf32>
    %10 = vector.shape_cast %9 : vector<32xf32> to vector<32x1xf32>
    %11 = arith.addf %8, %10 : vector<32x1xf32>
    %c0_9 = arith.constant 0 : index
    %c0_10 = arith.constant 0 : index
    %c0_11 = arith.constant 0 : index
    %12 = vector.load %arg4[%c0_9, %c0_10, %c0_11] : memref<1x32x1xf32, #tpu.memory_space<vmem>>, vector<1x32x1xf32>
    %13 = vector.shape_cast %12 : vector<1x32x1xf32> to vector<32x1xf32>
    %14 = vector.shape_cast %11 : vector<32x1xf32> to vector<1x32x1xf32>
    tpu.vector_store %arg4[%c0_9, %c0_10, %c0_11], %14 {strides = array<i32>} : memref<1x32x1xf32, #tpu.memory_space<vmem>>, vector<1x32x1xf32>,
    %c0_12 = arith.constant 0 : index
    %c0_13 = arith.constant 0 : index
    %c0_14 = arith.constant 0 : index
    %15 = vector.load %arg5[%c0_12, %c0_13, %c0_14] : memref<1x32x1xf32, #tpu.memory_space<vmem>>, vector<1x32x1xf32>
    %16 = vector.shape_cast %15 : vector<1x32x1xf32> to vector<32x1xf32>
    %17 = arith.mulf %6, %6 : vector<32x256xf32>
    %cst_15 = arith.constant dense<0.000000e+00> : vector<32xf32>
    %18 = vector.multi_reduction <add>, %17, %cst_15 [1] : vector<32x256xf32> to vector<32xf32>
    %19 = vector.shape_cast %18 : vector<32xf32> to vector<32x1xf32>
    %20 = arith.addf %16, %19 : vector<32x1xf32>
    %c0_16 = arith.constant 0 : index
    %c0_17 = arith.constant 0 : index
    %c0_18 = arith.constant 0 : index
    %21 = vector.load %arg5[%c0_16, %c0_17, %c0_18] : memref<1x32x1xf32, #tpu.memory_space<vmem>>, vector<1x32x1xf32>
    %22 = vector.shape_cast %21 : vector<1x32x1xf32> to vector<32x1xf32>
    %23 = vector.shape_cast %20 : vector<32x1xf32> to vector<1x32x1xf32>
    tpu.vector_store %arg5[%c0_16, %c0_17, %c0_18], %23 {strides = array<i32>} : memref<1x32x1xf32, #tpu.memory_space<vmem>>, vector<1x32x1xf32>,
    return
  }
  func.func @transform_0(%arg0: i32, %arg1: i32) -> (i32, i32, i32) {
    %c0_i32 = arith.constant 0 : i32
    %c0_i32_0 = arith.constant 0 : i32
    return %arg0, %c0_i32, %arg1 : i32, i32, i32
  }
  func.func @transform_1(%arg0: i32, %arg1: i32) -> (i32, i32) {
    %c0_i32 = arith.constant 0 : i32
    %c0_i32_0 = arith.constant 0 : i32
    %c0_i32_1 = arith.constant 0 : i32
    return %c0_i32, %c0_i32_0 : i32, i32
  }
  func.func @transform_2(%arg0: i32, %arg1: i32) -> (i32, i32, i32) {
    %c0_i32 = arith.constant 0 : i32
    %c0_i32_0 = arith.constant 0 : i32
    %c0_i32_1 = arith.constant 0 : i32
    return %arg0, %c0_i32, %c0_i32_0 : i32, i32, i32
  }
  func.func @transform_3(%arg0: i32, %arg1: i32) -> (i32, i32, i32) {
    %c0_i32 = arith.constant 0 : i32
    %c0_i32_0 = arith.constant 0 : i32
    %c0_i32_1 = arith.constant 0 : i32
    return %arg0, %c0_i32, %c0_i32_0 : i32, i32, i32
  }
}

module attributes {stable_mosaic.version = 11 : i64} {
  func.func @apply_kernel(%arg0: i32, %arg1: i32, %arg2: memref<1x4x256xf32, #tpu.memory_space<vmem>>, %arg3: memref<32x4xf32, #tpu.memory_space<vmem>>, %arg4: memref<32x1xf32, #tpu.memory_space<vmem>>, %arg5: memref<8x32xf32, #tpu.memory_space<vmem>>, %arg6: memref<8x1xf32, #tpu.memory_space<vmem>>, %arg7: memref<1x8x256xf32, #tpu.memory_space<vmem>>) attributes {dimension_semantics = [#tpu.dimension_semantics<parallel>, #tpu.dimension_semantics<parallel>], iteration_bounds = array<i64: 2, 1>, scalar_prefetch = 0 : i64, scratch_operands = 0 : i64, tpu.core_type = #tpu.core_type<tc>, window_params = [{transform_indices = @transform_0, window_bounds = array<i64: 1, 4, 256>}, {pipeline_mode = #tpu.pipeline_mode<synchronous>, transform_indices = @transform_1, window_bounds = array<i64: 32, 4>}, {pipeline_mode = #tpu.pipeline_mode<synchronous>, transform_indices = @transform_2, window_bounds = array<i64: 32, 1>}, {pipeline_mode = #tpu.pipeline_mode<synchronous>, transform_indices = @transform_3, window_bounds = array<i64: 8, 32>}, {pipeline_mode = #tpu.pipeline_mode<synchronous>, transform_indices = @transform_4, window_bounds = array<i64: 8, 1>}, {transform_indices = @transform_5, window_bounds = array<i64: 1, 8, 256>}]} {
    %c0 = arith.constant 0 : index
    %c0_0 = arith.constant 0 : index
    %c0_1 = arith.constant 0 : index
    %0 = vector.load %arg2[%c0, %c0_0, %c0_1] : memref<1x4x256xf32, #tpu.memory_space<vmem>>, vector<1x4x256xf32>
    %1 = vector.shape_cast %0 : vector<1x4x256xf32> to vector<4x256xf32>
    %c0_2 = arith.constant 0 : index
    %c0_3 = arith.constant 0 : index
    %2 = vector.load %arg3[%c0_2, %c0_3] : memref<32x4xf32, #tpu.memory_space<vmem>>, vector<32x4xf32>
    %cst = arith.constant dense<0.000000e+00> : vector<32x256xf32>
    %3 = tpu.matmul %2, %1, %cst {dimension_numbers = #tpu.dot_dimension_numbers<[1], [0], [0], [1], [0, 0, 1, 1], [], []>} : vector<32x4xf32>, vector<4x256xf32>, vector<32x256xf32> -> vector<32x256xf32>
    %c0_4 = arith.constant 0 : index
    %c0_5 = arith.constant 0 : index
    %4 = vector.load %arg4[%c0_4, %c0_5] : memref<32x1xf32, #tpu.memory_space<vmem>>, vector<32x1xf32>
    %5 = vector.broadcast %4 : vector<32x1xf32> to vector<32x256xf32>
    %6 = arith.addf %3, %5 : vector<32x256xf32>
    %cst_6 = arith.constant 0.000000e+00 : f32
    %7 = vector.broadcast %cst_6 : f32 to vector<32x256xf32>
    %8 = arith.maximumf %6, %7 : vector<32x256xf32>
    %c0_7 = arith.constant 0 : index
    %c0_8 = arith.constant 0 : index
    %9 = vector.load %arg5[%c0_7, %c0_8] : memref<8x32xf32, #tpu.memory_space<vmem>>, vector<8x32xf32>
    %cst_9 = arith.constant dense<0.000000e+00> : vector<8x256xf32>
    %10 = tpu.matmul %9, %8, %cst_9 {dimension_numbers = #tpu.dot_dimension_numbers<[1], [0], [0], [1], [0, 0, 1, 1], [], []>} : vector<8x32xf32>, vector<32x256xf32>, vector<8x256xf32> -> vector<8x256xf32>
    %c0_10 = arith.constant 0 : index
    %c0_11 = arith.constant 0 : index
    %11 = vector.load %arg6[%c0_10, %c0_11] : memref<8x1xf32, #tpu.memory_space<vmem>>, vector<8x1xf32>
    %12 = vector.broadcast %11 : vector<8x1xf32> to vector<8x256xf32>
    %13 = arith.addf %10, %12 : vector<8x256xf32>
    %c0_12 = arith.constant 0 : index
    %c0_13 = arith.constant 0 : index
    %c0_14 = arith.constant 0 : index
    %14 = vector.load %arg7[%c0_12, %c0_13, %c0_14] : memref<1x8x256xf32, #tpu.memory_space<vmem>>, vector<1x8x256xf32>
    %15 = vector.shape_cast %14 : vector<1x8x256xf32> to vector<8x256xf32>
    %16 = vector.shape_cast %13 : vector<8x256xf32> to vector<1x8x256xf32>
    tpu.vector_store %arg7[%c0_12, %c0_13, %c0_14], %16 {strides = array<i32>} : memref<1x8x256xf32, #tpu.memory_space<vmem>>, vector<1x8x256xf32>,
    return
  }
  func.func @transform_0(%arg0: i32, %arg1: i32) -> (i32, i32, i32) {
    %c0_i32 = arith.constant 0 : i32
    %c0_i32_0 = arith.constant 0 : i32
    return %arg0, %c0_i32, %arg1 : i32, i32, i32
  }
  func.func @transform_1(%arg0: i32, %arg1: i32) -> (i32, i32) {
    %c0_i32 = arith.constant 0 : i32
    %c0_i32_0 = arith.constant 0 : i32
    %c0_i32_1 = arith.constant 0 : i32
    return %c0_i32, %c0_i32_0 : i32, i32
  }
  func.func @transform_2(%arg0: i32, %arg1: i32) -> (i32, i32) {
    %c0_i32 = arith.constant 0 : i32
    %c0_i32_0 = arith.constant 0 : i32
    %c0_i32_1 = arith.constant 0 : i32
    return %c0_i32, %c0_i32_0 : i32, i32
  }
  func.func @transform_3(%arg0: i32, %arg1: i32) -> (i32, i32) {
    %c0_i32 = arith.constant 0 : i32
    %c0_i32_0 = arith.constant 0 : i32
    %c0_i32_1 = arith.constant 0 : i32
    return %c0_i32, %c0_i32_0 : i32, i32
  }
  func.func @transform_4(%arg0: i32, %arg1: i32) -> (i32, i32) {
    %c0_i32 = arith.constant 0 : i32
    %c0_i32_0 = arith.constant 0 : i32
    %c0_i32_1 = arith.constant 0 : i32
    return %c0_i32, %c0_i32_0 : i32, i32
  }
  func.func @transform_5(%arg0: i32, %arg1: i32) -> (i32, i32, i32) {
    %c0_i32 = arith.constant 0 : i32
    %c0_i32_0 = arith.constant 0 : i32
    return %arg0, %c0_i32, %arg1 : i32, i32, i32
  }
}

</mosaic_0001>

<bundles_post_ra>
// kernel: rfpm_output_net.3
= control target key start
LH: loop header
LB: loop body
LE: loop exit
PB: predicated region body
PF: predicated region fallthrough
CT: control target
= control target key end

     0   :  { %s631_s18 = smov 0   ;;  %s633_s19 = smov 0   ;;  %s706_s0 = inlined_call_operand.vmem [shape: f32[2,4,256], index: 0, kind: input, shape index: {}]   ;;  %s707_s1 = inlined_call_operand.vmem [shape: f32[32,4], index: 1, kind: input, shape index: {}]   ;;  %s708_s2 = inlined_call_operand.vmem [shape: f32[32,1], index: 2, kind: input, shape index: {}]   ;;  %s709_s3 = inlined_call_operand.vmem [shape: f32[8,32], index: 3, kind: input, shape index: {}]   ;;  %s710_s4 = inlined_call_operand.vmem [shape: f32[8,1], index: 4, kind: input, shape index: {}]   ;;  %s711_s5 = inlined_call_operand.vmem [shape: f32[2,8,256], index: 5, kind: output, shape index: {}]  }
   0x1   :  { %s635_s20 = smov 0  }
   0x2 LB: > { %s27_s21 = sadd.s32 1, %s594_s19  ;;  %p525_p0 = scmp.ge.s32.totalorder %s598_s20, 1  ;;  %s598_s20 = sphi %s635_s20, %s15_s20   ;;  %s594_s19 = sphi %s633_s19, %s713_s19   ;;  %s590_s18 = sphi %s631_s18, %s712_s18  }
   0x3   : > { %p29_p1 = scmp.ge.s32.totalorder %s27_s21, 2  ;;  %p208_p2 = scmp.lt.s32.totalorder %s598_s20, 3 }
   0x5   : > { %s715_s21 = smov (%p29_p1, %s27_s21), 0  ;;  %p209_p3 = pnand %p525_p0, %p208_p2 }
   0x6   : > { %p245_p4 = scmp.lt.s32.totalorder (!%p209_p3), %s590_s18, 1 }
   0x7   : > { %212 = sbr.rel (%p209_p3) target bundleno = 312 (0x138), region = 40 }
   0xc   : > { %v600_v0 = vmov 0   ;;  %v270_v1 = vld [vmem:[%s708_s2 + $0x8] sm:$0xff]  ;;  %v272_v2 = vld [vmem:[%s708_s2 + $0x18] sm:$0xff]  ;;  %s717_s18 = smov (!%p245_p4, %s590_s18), 1  ;;  %v269_v4 = vld [vmem:[%s708_s2] sm:$0xff]  ;;  %vm310_vm0 = vcmask 1043456  }
   0xd   : > { %574 = vset.pattern.permute.xlu1 %v600_v0  ;;  %573 = vset.pattern.permute.xlu0 %v600_v0  ;;  %s544_s26 = sshll.u32 %s717_s18, 3  ;;  %v271_v5 = vld [vmem:[%s708_s2 + $0x10] sm:$0xff]  ;;  %v265_v6 = vld [vmem:[%s707_s1] sm:$0xff]  ;;  %vm297_vm1 = vcmask 31744   ;;  %v268_v9 = vld [vmem:[%s707_s1 + $0x18] sm:$0xff]  ;;  %vm388_vm2 = vcmask 261120  }
   0xe   : > { %280 = vperm.xlu1 %574, %v270_v1   ;;  %290 = vperm.xlu0 %573, %v272_v2   ;;  %s252_s29 = scalar_lea.vmem %s706_s0, %s544_s26  ;;  %v266_v10 = vld [vmem:[%s707_s1 + $0x8] sm:$0xff]  ;;  %v267_v11 = vld [vmem:[%s707_s1 + $0x10] sm:$0xff]  ;;  %v382_v12 = vld [vmem:[%s710_s4] sm:$0xff]  ;;  %s545_s25 = sshll.u32 %s717_s18, 4 }
   0xf   : > { %575 = vset.pattern.permute.xlu2 %v600_v0  ;;  %v264_v3 = vld [vmem:[%s252_s29] sm:$0xff]  ;;  %s262_s28 = scalar_lea.vmem %s711_s5, %s545_s25 }
  0x10   : > { %294 = vst [vmem:[#allocation1] ss:$2 sm:$0xff] %v264_v3  ;;  %385 = vperm.xlu2 %575, %v382_v12   ;;  %v381_v40 = vld [vmem:[%s709_s3] sm:$0xff] }
  0x16   : > { %275 = vperm.xlu1 %574, %v269_v4   ;;  %285 = vperm.xlu0 %573, %v271_v5  }
  0x17   : > { %v295_v7 = vld.sshfl [vmem:[#allocation1] sm:$0xff pattern:$0x75316420]  ;;  %v296_v8 = vld.sshfl [vmem:[#allocation1 + $0x8] sm:$0xff pattern:$0x75316420] }
  0x18   : > { %530 = vmatpush.msk.msra.mxu0 %vm310_vm0, %v295_v7  ;;  %535 = vmatpush.msk.msra.mxu1 %vm310_vm0, %v296_v8 }
  0x19   : > { %531 = vmatmul.msk.f32.vlgmr.msra.gmra.mxu0 %vm297_vm1, %v265_v6  ;;  %536 = vmatmul.msk.f32.vlgmr.msra.gmra.mxu1 %vm297_vm1, %v265_v6 }
  0x1a   : > { %546 = vmatpush.msk.msra.mxu2 %vm310_vm0, %v295_v7  ;;  %547 = vmatpush.msk.msra.mxu3 %vm310_vm0, %v296_v8 }
  0x1b   : > { %534 = vmatmul.msk.f32.vlgmr.msra.gmra.mxu2 %vm297_vm1, %v268_v9  ;;  %539 = vmatmul.msk.f32.vlgmr.msra.gmra.mxu3 %vm297_vm1, %v268_v9 }
  0x21   : > { %532 = vmatmul.msk.f32.gmra.mxu0 %vm297_vm1, %v266_v10  ;;  %537 = vmatmul.msk.f32.gmra.mxu1 %vm297_vm1, %v266_v10 }
  0x29   : > { %533 = vmatmul.msk.f32.gmra.mxu0 %vm297_vm1, %v267_v11  ;;  %538 = vmatmul.msk.f32.gmra.mxu1 %vm297_vm1, %v267_v11 }
  0x6a   : > { %v386_v42 = vpop.permute.xlu2 %385 }
  0x80   : > { %v281_v15 = vpop.permute.xlu1 %280  ;;  %v291_v16 = vpop.permute.xlu0 %290 }
  0x88   : > { %v276_v25 = vpop.permute.xlu1 %275  ;;  %v286_v26 = vpop.permute.xlu0 %285 }
  0x96   : > { %v332_v13 = vpop.f32.mrf.mxu0  ;;  %v361_v14 = vpop.f32.mrf.mxu1 }
  0x97   : > { %v333_v33 = vadd.f32 %v332_v13, %v276_v25  ;;  %v362_v35 = vadd.f32 %v361_v14, %v276_v25 }
  0x99   : > { %v373_v39 = vmax.f32 %v333_v33, 0.0  ;;  %v374_v41 = vmax.f32 %v362_v35, 0.0 }
  0x9e   : > { %v335_v17 = vpop.f32.mrf.mxu0  ;;  %v341_v18 = vpop.f32.mrf.mxu2 }
  0x9f   : > { %v342_v19 = vadd.f32 %v341_v18, %v291_v16  ;;  %v364_v20 = vpop.f32.mrf.mxu1  ;;  %v370_v21 = vpop.f32.mrf.mxu3  ;;  %v336_v28 = vadd.f32 %v335_v17, %v281_v15 }
  0xa0   : > { %v371_v22 = vadd.f32 %v370_v21, %v291_v16  ;;  %v365_v31 = vadd.f32 %v364_v20, %v281_v15 }
  0xa1   : > { %v379_v23 = vmax.f32 %v342_v19, 0.0  ;;  %v375_v37 = vmax.f32 %v336_v28, 0.0 }
  0xa2   : > { %v380_v24 = vmax.f32 %v371_v22, 0.0  ;;  %v376_v38 = vmax.f32 %v365_v31, 0.0 }
  0xa3   : > { %404 = vmatpush.msrb.mxu2 %v379_v23 }
  0xa4   : > { %424 = vmatpush.msrb.mxu3 %v380_v24 }
  0xa6   : > { %v338_v27 = vpop.f32.mrf.mxu0 }
  0xa7   : > { %v339_v29 = vadd.f32 %v338_v27, %v286_v26  ;;  %v367_v30 = vpop.f32.mrf.mxu1 }
  0xa8   : > { %v368_v32 = vadd.f32 %v367_v30, %v286_v26 }
  0xa9   : > { %v377_v34 = vmax.f32 %v339_v29, 0.0 }
  0xaa   : > { %v378_v36 = vmax.f32 %v368_v32, 0.0 }
  0xab   : > { %405 = vmatpush.msrb.mxu2 %v377_v34 }
  0xac   : > { %425 = vmatpush.msrb.mxu3 %v378_v36 }
  0xad   : > { %406 = vmatpush.msrb.mxu2 %v375_v37 }
  0xae   : > { %426 = vmatpush.msrb.mxu3 %v376_v38 }
  0xaf   : > { %407 = vmatpush.msrb.mxu2 %v373_v39 }
  0xb0   : > { %427 = vmatpush.msrb.mxu3 %v374_v41  ;;  %540 = vmatmul.msk.f32.vlgmr.msrb.gmra.mxu2 %vm388_vm2, %v381_v40 }
  0xb1   : > { %541 = vmatmul.msk.f32.vlgmr.msrb.gmra.mxu3 %vm388_vm2, %v381_v40 }
 0x133   : > { %v409_v43 = vpop.f32.mrf.mxu2 }
 0x134   : > { %v410_v44 = vadd.f32 %v409_v43, %v386_v42  ;;  %v429_v45 = vpop.f32.mrf.mxu3 }
 0x135   : > { %v430_v46 = vadd.f32 %v429_v45, %v386_v42 }
 0x136   : > { %432 = vst [vmem:[%s262_s28] sm:$0xff] %v410_v44 }
 0x137   : > { %433 = vst [vmem:[%s262_s28 + $0x8] sm:$0xff] %v430_v46 }
 0x138 PF: > { %s15_s20 = sadd.s32 1, %s598_s20   ;;  %s712_s18 = smov %s594_s19 }
 0x139   : > { %p12_p5 = scmp.ge.s32.totalorder %s15_s20, 4   ;;  %s713_s19 = smov %s715_s21 }
 0x13b   :  { %14 = sbr.rel (!%p12_p5) target bundleno = 2 (0x2), region = 70 }

// kernel: rfpm_output_net.2
= control target key start
LH: loop header
LB: loop body
LE: loop exit
PB: predicated region body
PF: predicated region fallthrough
CT: control target
= control target key end

     0   :  { %s567_s12 = smov 0   ;;  %s569_s13 = smov 0   ;;  %s671_s0 = inlined_call_operand.vmem [shape: f32[2,4,256], index: 0, kind: input, shape index: {}]   ;;  %s672_s1 = inlined_call_operand.vmem [shape: f32[32,4], index: 1, kind: input, shape index: {}]   ;;  %s673_s2 = inlined_call_operand.vmem [shape: f32[2,32,1], index: 2, kind: output, shape index: {0}]   ;;  %s674_s3 = inlined_call_operand.vmem [shape: f32[2,32,1], index: 3, kind: output, shape index: {1}]  }
   0x1   :  { %s571_s14 = smov 0  }
   0x2 LB: > { %s26_s15 = sadd.s32 1, %s540_s13  ;;  %p473_p0 = scmp.ge.s32.totalorder %s544_s14, 1  ;;  %s544_s14 = sphi %s571_s14, %s14_s14   ;;  %s540_s13 = sphi %s569_s13, %s676_s13   ;;  %s536_s12 = sphi %s567_s12, %s675_s12  }
   0x3   : > { %p28_p1 = scmp.ge.s32.totalorder %s26_s15, 2  ;;  %p159_p2 = scmp.lt.s32.totalorder %s544_s14, 3 }
   0x5   : > { %s678_s15 = smov (%p28_p1, %s26_s15), 0  ;;  %p160_p3 = pnand %p473_p0, %p159_p2 }
   0x6   : > { %p193_p4 = scmp.lt.s32.totalorder (!%p160_p3), %s536_s12, 1 }
   0x7   : > { %163 = sbr.rel (%p160_p3) target bundleno = 296 (0x128), region = 28 }
   0xc   : > { %s680_s12 = smov (!%p193_p4, %s536_s12), 1  ;;  %vm247_vm0 = vcmask 1043456   ;;  %v226_v1 = vld [vmem:[%s672_s1] sm:$0xff]  ;;  %vm234_vm1 = vcmask 31744   ;;  %v228_v2 = vld [vmem:[%s672_s1 + $0x10] sm:$0xff]  ;;  %v227_v5 = vld [vmem:[%s672_s1 + $0x8] sm:$0xff] }
   0xd   : > { %s492_s16 = sshll.u32 %s680_s12, 3  ;;  %v229_v6 = vld [vmem:[%s672_s1 + $0x18] sm:$0xff]  ;;  %s493_s28 = sshll.u32 %s680_s12, 5  ;;  %vm216_vm2 = vcmask 7168   ;;  %v546_v7 = vmov 0.0  }
   0xe   : > { %s200_s19 = scalar_lea.vmem %s671_s0, %s492_s16  ;;  %s615_s4 = scalar_lea.vmem %s673_s2, %s493_s28 }
   0xf   : > { %v225_v0 = vld [vmem:[%s200_s19] sm:$0xff]  ;;  %217 = vst.msk [vmem:[%s615_s4] sm:$0xff] %vm216_vm2, %v546_v7  ;;  %s624_s7 = scalar_lea.vmem %s674_s3, %s493_s28 }
  0x10   : > { %231 = vst [vmem:[#allocation1] ss:$2 sm:$0xff] %v225_v0 }
  0x11   : > { %218 = vst.msk [vmem:[%s615_s4 + $0x8] sm:$0xff] %vm216_vm2, %v546_v7 }
  0x12   : > { %219 = vst.msk [vmem:[%s615_s4 + $0x10] sm:$0xff] %vm216_vm2, %v546_v7 }
  0x13   : > { %220 = vst.msk [vmem:[%s615_s4 + $0x18] sm:$0xff] %vm216_vm2, %v546_v7 }
  0x14   : > { %221 = vst.msk [vmem:[%s624_s7] sm:$0xff] %vm216_vm2, %v546_v7 }
  0x15   : > { %222 = vst.msk [vmem:[%s624_s7 + $0x8] sm:$0xff] %vm216_vm2, %v546_v7 }
  0x16   : > { %223 = vst.msk [vmem:[%s624_s7 + $0x10] sm:$0xff] %vm216_vm2, %v546_v7  ;;  %v310_v32 = vld [vmem:[%s615_s4] sm:$0xff] }
  0x17   : > { %v232_v3 = vld.sshfl [vmem:[#allocation1] sm:$0xff pattern:$0x75316420]  ;;  %v233_v4 = vld.sshfl [vmem:[#allocation1 + $0x8] sm:$0xff pattern:$0x75316420] }
  0x18   : > { %480 = vmatpush.msk.msra.mxu0 %vm247_vm0, %v232_v3  ;;  %495 = vmatpush.msk.msra.mxu2 %vm247_vm0, %v232_v3  ;;  %224 = vst.msk [vmem:[%s624_s7 + $0x18] sm:$0xff] %vm216_vm2, %v546_v7  ;;  %v311_v40 = vld [vmem:[%s615_s4 + $0x8] sm:$0xff] }
  0x19   : > { %485 = vmatpush.msk.msra.mxu1 %vm247_vm0, %v233_v4  ;;  %496 = vmatpush.msk.msra.mxu3 %vm247_vm0, %v233_v4  ;;  %v312_v38 = vld [vmem:[%s615_s4 + $0x10] sm:$0xff] }
  0x1a   : > { %481 = vmatmul.msk.f32.vlgmr.msra.gmra.mxu0 %vm234_vm1, %v226_v1  ;;  %483 = vmatmul.msk.f32.vlgmr.msra.gmra.mxu2 %vm234_vm1, %v228_v2  ;;  %v313_v47 = vld [vmem:[%s615_s4 + $0x18] sm:$0xff] }
  0x1b   : > { %486 = vmatmul.msk.f32.vlgmr.msra.gmra.mxu1 %vm234_vm1, %v226_v1  ;;  %488 = vmatmul.msk.f32.vlgmr.msra.gmra.mxu3 %vm234_vm1, %v228_v2  ;;  %v335_v34 = vld [vmem:[%s624_s7] sm:$0xff] }
  0x1c   : > { %v336_v43 = vld [vmem:[%s624_s7 + $0x8] sm:$0xff] }
  0x1d   : > { %v337_v49 = vld [vmem:[%s624_s7 + $0x10] sm:$0xff] }
  0x1f   : > { %v338_v53 = vld [vmem:[%s624_s7 + $0x18] sm:$0xff] }
  0x22   : > { %482 = vmatmul.msk.f32.gmra.mxu0 %vm234_vm1, %v227_v5  ;;  %484 = vmatmul.msk.f32.gmra.mxu2 %vm234_vm1, %v229_v6 }
  0x23   : > { %487 = vmatmul.msk.f32.gmra.mxu1 %vm234_vm1, %v227_v5  ;;  %489 = vmatmul.msk.f32.gmra.mxu3 %vm234_vm1, %v229_v6 }
  0x97   : > { %v269_v8 = vpop.f32.mrf.mxu0 }
  0x98   : > { %v339_v9 = vmul.f32 %v269_v8, %v269_v8  ;;  %v298_v10 = vpop.f32.mrf.mxu1 }
  0x99   : > { %v340_v11 = vmul.f32 %v298_v10, %v298_v10  ;;  %v314_v12 = vadd.f32 %v298_v10, %v269_v8 }
  0x9b   : > { %315 = vadd.xlane.f32.xlu0 %v314_v12  ;;  %v347_v13 = vadd.f32 %v340_v11, %v339_v9 }
  0x9d   : > { %v275_v14 = vpop.f32.mrf.mxu2  ;;  %348 = vadd.xlane.f32.xlu2 %v347_v13 }
  0x9e   : > { %v304_v15 = vpop.f32.mrf.mxu3  ;;  %v343_v23 = vmul.f32 %v275_v14, %v275_v14 }
  0x9f   : > { %v272_v16 = vpop.f32.mrf.mxu0  ;;  %v320_v17 = vadd.f32 %v304_v15, %v275_v14  ;;  %v344_v24 = vmul.f32 %v304_v15, %v304_v15 }
  0xa0   : > { %v341_v18 = vmul.f32 %v272_v16, %v272_v16  ;;  %v301_v19 = vpop.f32.mrf.mxu1 }
  0xa1   : > { %v317_v20 = vadd.f32 %v301_v19, %v272_v16  ;;  %v342_v21 = vmul.f32 %v301_v19, %v301_v19  ;;  %321 = vadd.xlane.f32.xlu1 %v320_v17  ;;  %v353_v28 = vadd.f32 %v344_v24, %v343_v23 }
  0xa3   : > { %318 = vadd.xlane.f32.xlu0 %v317_v20  ;;  %v350_v22 = vadd.f32 %v342_v21, %v341_v18 }
  0xa5   : > { %v278_v25 = vpop.f32.mrf.mxu2  ;;  %351 = vadd.xlane.f32.xlu2 %v350_v22 }
  0xa6   : > { %v307_v26 = vpop.f32.mrf.mxu3  ;;  %v345_v29 = vmul.f32 %v278_v25, %v278_v25 }
  0xa7   : > { %v323_v27 = vadd.f32 %v307_v26, %v278_v25  ;;  %v346_v30 = vmul.f32 %v307_v26, %v307_v26 }
  0xa9   : > { %324 = vadd.xlane.f32.xlu1 %v323_v27  ;;  %v356_v31 = vadd.f32 %v346_v30, %v345_v29 }
  0xab   : > { %354 = vadd.xlane.f32.xlu0 %v353_v28 }
  0xb1   : > { %357 = vadd.xlane.f32.xlu1 %v356_v31 }
 0x10e   : > { %v316_v33 = vpop.xlane.xlu0 %315 }
 0x10f   : > { %v326_v35 = vadd.f32 %v316_v33, %v310_v32 }
 0x110   : > { %v349_v36 = vpop.xlane.xlu2 %348 }
 0x111   : > { %331 = vst.msk [vmem:[%s615_s4] sm:$0xff] %vm216_vm2, %v326_v35  ;;  %v359_v37 = vadd.f32 %v349_v36, %v335_v34 }
 0x113   : > { %363 = vst.msk [vmem:[%s624_s7] sm:$0xff] %vm216_vm2, %v359_v37 }
 0x114   : > { %v322_v39 = vpop.xlane.xlu1 %321 }
 0x115   : > { %v328_v41 = vadd.f32 %v322_v39, %v312_v38 }
 0x116   : > { %v319_v42 = vpop.xlane.xlu0 %318 }
 0x117   : > { %333 = vst.msk [vmem:[%s615_s4 + $0x10] sm:$0xff] %vm216_vm2, %v328_v41  ;;  %v327_v44 = vadd.f32 %v319_v42, %v311_v40 }
 0x118   : > { %v352_v45 = vpop.xlane.xlu2 %351 }
 0x119   : > { %332 = vst.msk [vmem:[%s615_s4 + $0x8] sm:$0xff] %vm216_vm2, %v327_v44  ;;  %v360_v46 = vadd.f32 %v352_v45, %v336_v43 }
 0x11b   : > { %364 = vst.msk [vmem:[%s624_s7 + $0x8] sm:$0xff] %vm216_vm2, %v360_v46 }
 0x11c   : > { %v325_v48 = vpop.xlane.xlu1 %324 }
 0x11d   : > { %v329_v50 = vadd.f32 %v325_v48, %v313_v47 }
 0x11e   : > { %v355_v51 = vpop.xlane.xlu0 %354 }
 0x11f   : > { %334 = vst.msk [vmem:[%s615_s4 + $0x18] sm:$0xff] %vm216_vm2, %v329_v50  ;;  %v361_v52 = vadd.f32 %v355_v51, %v337_v49 }
 0x121   : > { %365 = vst.msk [vmem:[%s624_s7 + $0x10] sm:$0xff] %vm216_vm2, %v361_v52 }
 0x124   : > { %v358_v54 = vpop.xlane.xlu1 %357 }
 0x125   : > { %v362_v55 = vadd.f32 %v358_v54, %v338_v53 }
 0x127   : > { %366 = vst.msk [vmem:[%s624_s7 + $0x18] sm:$0xff] %vm216_vm2, %v362_v55 }
 0x128 PF: > { %s14_s14 = sadd.s32 1, %s544_s14   ;;  %s675_s12 = smov %s540_s13 }
 0x129   : > { %p11_p5 = scmp.ge.s32.totalorder %s14_s14, 4   ;;  %s676_s13 = smov %s678_s15 }
 0x12b   :  { %13 = sbr.rel (!%p11_p5) target bundleno = 2 (0x2), region = 74 }

</bundles_post_ra>
